<compile_context>
chip_gen: v5e
topology: v5e:2x2
jax: 0.10.0
libtpu: 0.0.40
codegen_flags: <defaults>
</compile_context>

<pallas_src>
import functools

import jax
import jax.numpy as jnp
from jax.experimental import pallas as pl
from jax.experimental.pallas import tpu as pltpu


def _round_up(x, m):
    return (x + m - 1) // m * m


def gcn_kernel(adj_ref, xw_ref, b_ref, out_ref, acc_ref, *, tk, xw_resident):
    k = pl.program_id(1)

    @pl.when(k == 0)
    def _init():
        acc_ref[...] = jnp.zeros_like(acc_ref)

    if xw_resident:
        # XW lives fully in VMEM (DMA'd once for the whole grid); slice the k-block.
        off = pl.multiple_of(k * tk, 128)
        xw_blk = xw_ref[pl.ds(off, tk), :]
    else:
        xw_blk = xw_ref[...]

    # Neighbor aggregation on the pre-projected features: (A tile) @ (XW block).
    acc_ref[...] += jnp.dot(adj_ref[...], xw_blk,
                            preferred_element_type=jnp.float32)

    @pl.when(k == pl.num_programs(1) - 1)
    def _finalize():
        # Bias added once per output tile (not per reduction step).
        out_ref[...] = (acc_ref[...] + b_ref[...]).astype(out_ref.dtype)


def gcn_layer(adj, x, weight, bias, *, tm_target=1024, tk_target=2048,
              compute_dtype=jnp.bfloat16,
              xw_resident_budget=8 * 1024 * 1024):
    """adj: [N, N], x: [N, in_feats], weight: [out_feats, in_feats], bias: [out_feats].

    Returns A @ X @ W^T + b with shape [N, out_feats].
    """
    n, in_feats = x.shape
    out_feats = weight.shape[0]
    out_dtype = x.dtype

    # ---- Reorder contraction: XW = X @ W^T (tiny, done once, f32) -------------
    xw = jnp.dot(x.astype(jnp.float32), weight.astype(jnp.float32).T)   # [N, out_feats]

    # ---- Tile / padding geometry ----------------------------------------------
    f_pad = _round_up(out_feats, 128)                 # lane-dense output width
    tm = min(tm_target, _round_up(n, 16))             # row tile; mult of 16 (bf16 sublanes)
    if _round_up(n, tm) == tm and n > 16:
        # Only one row tile -> split so both TensorCores get work on the "parallel" axis.
        tm = max(16, _round_up((n + 1) // 2, 16))
    tk = min(tk_target, _round_up(n, 128))            # reduction tile (lane axis of A)
    n_rows = _round_up(n, tm)
    n_cols = _round_up(n, tk)

    # Cast BEFORE padding so no f32 padded copy of A is materialized.
    # (Zeros in the pad contribute nothing to the aggregation.)
    adj_p = jnp.pad(adj.astype(compute_dtype), ((0, n_rows - n), (0, n_cols - n)))
    xw_p = jnp.pad(xw.astype(compute_dtype), ((0, n_cols - n), (0, f_pad - out_feats)))
    b_p = jnp.pad(bias.astype(jnp.float32), (0, f_pad - out_feats)).reshape(1, f_pad)

    # Keep XW fully resident in VMEM when it fits (a few MiB for realistic N).
    xw_bytes = n_cols * f_pad * jnp.dtype(compute_dtype).itemsize
    xw_resident = xw_bytes <= xw_resident_budget
    if xw_resident:
        xw_spec = pl.BlockSpec((n_cols, f_pad), lambda i, k: (0, 0))
    else:
        xw_spec = pl.BlockSpec((tk, f_pad), lambda i, k: (k, 0))

    grid = (n_rows // tm, n_cols // tk)
    kernel = functools.partial(gcn_kernel, tk=tk, xw_resident=xw_resident)

    out_padded = pl.pallas_call(
        kernel,
        out_shape=jax.ShapeDtypeStruct((n_rows, f_pad), out_dtype),
        grid_spec=pltpu.PrefetchScalarGridSpec(
            num_scalar_prefetch=0,
            grid=grid,
            in_specs=[
                pl.BlockSpec((tm, tk), lambda i, k: (i, k)),    # A tile (streamed bf16)
                xw_spec,                                        # XW (resident if it fits)
                pl.BlockSpec((1, f_pad), lambda i, k: (0, 0)),  # bias
            ],
            out_specs=pl.BlockSpec((tm, f_pad), lambda i, k: (i, 0)),
            scratch_shapes=[pltpu.VMEM((tm, f_pad), jnp.float32)],
        ),
        compiler_params=pltpu.CompilerParams(
            dimension_semantics=("parallel", "arbitrary"),
            vmem_limit_bytes=48 * 1024 * 1024,   # enables >512 tiles on v5e, safe on v7x
        ),
    )(adj_p, xw_p, b_p)

    return out_padded[:n, :out_feats]


if __name__ == "__main__":
    key = jax.random.PRNGKey(0)
    k_adj, k_x, k_w, k_b = jax.random.split(key, 4)

    # Small graph: 64 nodes, in_feats=32, out_feats=16.
    n, in_feats, out_feats = 64, 32, 16

    # Deterministic symmetric adjacency with self loops, row-normalized.
    edges = (jax.random.uniform(k_adj, (n, n)) > 0.8).astype(jnp.float32)
    adj = jnp.clip(edges + edges.T + jnp.eye(n, dtype=jnp.float32), 0.0, 1.0)
    deg = jnp.sum(adj, axis=1, keepdims=True)
    adj = adj / deg

    x = jax.random.normal(k_x, (n, in_feats), dtype=jnp.float32)

    # nn.Linear(in_feats, out_feats): weight [out_feats, in_feats], bias [out_feats]
    bound = 1.0 / (in_feats ** 0.5)
    weight = jax.random.uniform(k_w, (out_feats, in_feats),
                                minval=-bound, maxval=bound, dtype=jnp.float32)
    bias = jax.random.uniform(k_b, (out_feats,),
                              minval=-bound, maxval=bound, dtype=jnp.float32)

    out = gcn_layer(adj, x, weight, bias)
    jax.block_until_ready(out)

    # Sanity check against pure-f32 JAX reference (kernel streams A/XW in bf16,
    # accumulates in f32, so allow bf16-level tolerance).
    ref = (adj @ x) @ weight.T + bias
    assert out.shape == (n, out_feats)
    assert jnp.allclose(out, ref, atol=2e-2, rtol=2e-2), float(jnp.max(jnp.abs(out - ref)))

    print("KERNEL_OK")
</pallas_src>

<mosaic_0001>
module attributes {stable_mosaic.version = 11 : i64} {
  func.func @gcn_kernel(%arg0: i32, %arg1: i32, %arg2: memref<32x128xbf16, #tpu.memory_space<vmem>>, %arg3: memref<128x128xbf16, #tpu.memory_space<vmem>>, %arg4: memref<1x128xf32, #tpu.memory_space<vmem>>, %arg5: memref<32x128xf32, #tpu.memory_space<vmem>>, %arg6: memref<32x128xf32, #tpu.memory_space<vmem>>) attributes {dimension_semantics = [#tpu.dimension_semantics<parallel>, #tpu.dimension_semantics<arbitrary>], iteration_bounds = array<i64: 2, 1>, scalar_prefetch = 0 : i64, scratch_operands = 1 : i64, tpu.core_type = #tpu.core_type<tc>, window_params = [{transform_indices = @transform_0, window_bounds = array<i64: 32, 128>}, {pipeline_mode = #tpu.pipeline_mode<synchronous>, transform_indices = @transform_1, window_bounds = array<i64: 128, 128>}, {pipeline_mode = #tpu.pipeline_mode<synchronous>, transform_indices = @transform_2, window_bounds = array<i64: 1, 128>}, {transform_indices = @transform_3, window_bounds = array<i64: 32, 128>}]} {
    %c0_i32 = arith.constant 0 : i32
    %0 = arith.cmpi eq, %arg1, %c0_i32 : i32
    %1 = arith.extui %0 : i1 to i32
    %c0_i32_0 = arith.constant 0 : i32
    %2 = arith.cmpi ne, %1, %c0_i32_0 : i32
    scf.if %2 {
      %cst_9 = arith.constant 0.000000e+00 : f32
      %15 = vector.broadcast %cst_9 : f32 to vector<32x128xf32>
      %c0_10 = arith.constant 0 : index
      %c0_11 = arith.constant 0 : index
      %16 = vector.load %arg6[%c0_10, %c0_11] : memref<32x128xf32, #tpu.memory_space<vmem>>, vector<32x128xf32>
      tpu.vector_store %arg6[%c0_10, %c0_11], %15 {strides = array<i32>} : memref<32x128xf32, #tpu.memory_space<vmem>>, vector<32x128xf32>,
    } else {
    }
    %c128_i32 = arith.constant 128 : i32
    %3 = arith.muli %arg1, %c128_i32 : i32
    %4 = tpu.assume_multiple %3, 128 : i32
    %5 = arith.index_cast %4 : i32 to index
    %c0 = arith.constant 0 : index
    %6 = vector.load %arg3[%5, %c0] : memref<128x128xbf16, #tpu.memory_space<vmem>>, vector<128x128xbf16>
    %c0_1 = arith.constant 0 : index
    %c0_2 = arith.constant 0 : index
    %7 = vector.load %arg6[%c0_1, %c0_2] : memref<32x128xf32, #tpu.memory_space<vmem>>, vector<32x128xf32>
    %c0_3 = arith.constant 0 : index
    %c0_4 = arith.constant 0 : index
    %8 = vector.load %arg2[%c0_3, %c0_4] : memref<32x128xbf16, #tpu.memory_space<vmem>>, vector<32x128xbf16>
    %cst = arith.constant dense<0.000000e+00> : vector<32x128xf32>
    %9 = tpu.matmul %8, %6, %cst {dimension_numbers = #tpu.dot_dimension_numbers<[1], [0], [0], [1], [0, 0, 1, 1], [], []>} : vector<32x128xbf16>, vector<128x128xbf16>, vector<32x128xf32> -> vector<32x128xf32>
    %10 = arith.addf %7, %9 : vector<32x128xf32>
    %c0_5 = arith.constant 0 : index
    %c0_6 = arith.constant 0 : index
    %11 = vector.load %arg6[%c0_5, %c0_6] : memref<32x128xf32, #tpu.memory_space<vmem>>, vector<32x128xf32>
    tpu.vector_store %arg6[%c0_5, %c0_6], %10 {strides = array<i32>} : memref<32x128xf32, #tpu.memory_space<vmem>>, vector<32x128xf32>,
    %c0_i32_7 = arith.constant 0 : i32
    %12 = arith.cmpi eq, %arg1, %c0_i32_7 : i32
    %13 = arith.extui %12 : i1 to i32
    %c0_i32_8 = arith.constant 0 : i32
    %14 = arith.cmpi ne, %13, %c0_i32_8 : i32
    scf.if %14 {
      %c0_9 = arith.constant 0 : index
      %c0_10 = arith.constant 0 : index
      %15 = vector.load %arg6[%c0_9, %c0_10] : memref<32x128xf32, #tpu.memory_space<vmem>>, vector<32x128xf32>
      %c0_11 = arith.constant 0 : index
      %c0_12 = arith.constant 0 : index
      %16 = vector.load %arg4[%c0_11, %c0_12] : memref<1x128xf32, #tpu.memory_space<vmem>>, vector<1x128xf32>
      %17 = vector.broadcast %16 : vector<1x128xf32> to vector<32x128xf32>
      %18 = arith.addf %15, %17 : vector<32x128xf32>
      %c0_13 = arith.constant 0 : index
      %c0_14 = arith.constant 0 : index
      %19 = vector.load %arg5[%c0_13, %c0_14] : memref<32x128xf32, #tpu.memory_space<vmem>>, vector<32x128xf32>
      tpu.vector_store %arg5[%c0_13, %c0_14], %18 {strides = array<i32>} : memref<32x128xf32, #tpu.memory_space<vmem>>, vector<32x128xf32>,
    } else {
    }
    return
  }
  func.func @transform_0(%arg0: i32, %arg1: i32) -> (i32, i32) {
    %c0_i32 = arith.constant 0 : i32
    return %arg0, %arg1 : i32, i32
  }
  func.func @transform_1(%arg0: i32, %arg1: i32) -> (i32, i32) {
    %c0_i32 = arith.constant 0 : i32
    %c0_i32_0 = arith.constant 0 : i32
    %c0_i32_1 = arith.constant 0 : i32
    return %c0_i32, %c0_i32_0 : i32, i32
  }
  func.func @transform_2(%arg0: i32, %arg1: i32) -> (i32, i32) {
    %c0_i32 = arith.constant 0 : i32
    %c0_i32_0 = arith.constant 0 : i32
    %c0_i32_1 = arith.constant 0 : i32
    return %c0_i32, %c0_i32_0 : i32, i32
  }
  func.func @transform_3(%arg0: i32, %arg1: i32) -> (i32, i32) {
    %c0_i32 = arith.constant 0 : i32
    %c0_i32_0 = arith.constant 0 : i32
    return %arg0, %c0_i32 : i32, i32
  }
}

</mosaic_0001>

<bundles_post_ra>
// kernel: tpu_custom_call.1
= control target key start
LH: loop header
LB: loop body
LE: loop exit
PB: predicated region body
PF: predicated region fallthrough
CT: control target
= control target key end

     0   :  { %s966_s0 = inlined_call_operand.hbm [shape: bf16[64,128], index: 0, kind: input, shape index: {}]   ;;  %s967_s1 = inlined_call_operand.hbm [shape: bf16[128,128], index: 1, kind: input, shape index: {}]   ;;  %s968_s2 = inlined_call_operand.vmem [shape: f32[1,128], index: 2, kind: input, shape index: {}]   ;;  %s969_s3 = inlined_call_operand.hbm [shape: f32[64,128], index: 3, kind: output, shape index: {}]  }
   0x1   :  { %971 = sst [smem:[#allocation12_spill]] %s967_s1 }
   0x2   :  { %8 = vsyncpa [#allocation4], 0 }
   0x3   :  { %10 = vsyncpa [#allocation4 + $0x1], 0 }
   0x4   :  { %11 = vsyncpa [#allocation7], 0 }
   0x5   :  { %12 = vsyncpa [#allocation5], 0 }
   0x6   :  { %14 = vsyncpa [#allocation5 + $0x1], 0  ;;  %s807_s12 = smov 0   ;;  %s809_s13 = smov 0  }
   0x7   :  { %s811_s14 = smov 0   ;;  %s813_s15 = smov 0  }
   0x8   :  { %s815_s16 = smov 0   ;;  %s817_s17 = smov 0  }
   0x9 LB: > { %s479_s18 = sadd.s32 4294967295, %s780_s17   ;;  %s480_s19 = sadd.s32 4294967294, %s780_s17   ;;  %s780_s17 = sphi %s817_s17, %s20_s17   ;;  %s776_s16 = sphi %s815_s16, %s985_s16   ;;  %s772_s15 = sphi %s813_s15, %s984_s15   ;;  %s768_s14 = sphi %s811_s14, %s983_s14   ;;  %s764_s13 = sphi %s809_s13, %s982_s13   ;;  %s760_s12 = sphi %s807_s12, %s981_s12  }
   0xa   : > { %p54_p0 = scmp.ne.s32.totalorder %s764_s13, %s760_s12  ;;  %p841_p1 = scmp.eq.s32.totalorder %s479_s18, 0 }
   0xb   : > { %p845_p2 = scmp.eq.s32.totalorder %s479_s18, 1  ;;  %p126_p3 = scmp.eq.s32.totalorder %s480_s19, 1 }
   0xc   : > { %p851_p4 = por %p841_p1, %p54_p0  ;;  %p481_p5 = scmp.ge.s32.totalorder %s780_s17, 1 }
   0xd   : > { %p856_p6 = por %p126_p3, %p54_p0  ;;  %p133_p7 = scmp.lt.s32.totalorder %s780_s17, 3 }
   0xe   : > { %s976_s1 = sld [smem:[#allocation12_spill]]  ;;  %s782_s28 = smov [#allocation6]  }
   0xf   : > { %p864_p8 = pnand %p481_p5, %p133_p7  ;;  %s146_s29 = sshll.u32 %s782_s28, 4  ;;  %s147_s29 = int_to_ptr.vmem [resolvable:$true] %s146_s29 }
  0x10   : > { %p483_p11 = scmp.ge.s32.totalorder %s780_s17, 2  ;;  %s970_s30 = smov 64  }
  0x11   : > { %p564_p9 = pneg %p864_p8  ;;  %s784_s4 = smov 4  }
  0x12   : > { %s32_s5 = sadd.s32 1, %s776_s16  ;;  %s41_s6 = sadd.s32 1, %s768_s14 }
  0x13   : > { %p565_p10 = pnand %p564_p9, %p841_p1  ;;  %p34_p12 = scmp.ge.s32.totalorder %s32_s5, 2 }
  0x14   : > { %s144_s26 = sshll.u32 %s976_s1, 4  ;;  %p48_p13 = scmp.ne.s32.totalorder %s768_s14, %s764_s13  ;;  %s145_s26 = int_to_ptr.hbm [resolvable:$true] %s144_s26 }
  0x15   : > { %567 = dma.hbm_to_vmem [thread:$0]  (!%p565_p10), %s145_s26, 1024, %s147_s29, [#allocation7], %s970_s30, %s970_s30, %s784_s4  }
  0x16   : > { %p49_p0 = scmp.eq.s32.totalorder %s780_s17, 0  ;;  %s987_s5 = smov (%p34_p12, %s32_s5), 0 }
  0x17   : > { %p889_p5 = por %p845_p2, %p48_p13  ;;  %s36_s9 = ssub.s32 %s776_s16, %s987_s5 }
  0x18   : > { %p883_p3 = por %p49_p0, %p48_p13  ;;  %p577_p7 = scmp.lt.s32.totalorder %s780_s17, 2 }
  0x19   : > { %p39_p9 = scmp.eq.s32.totalorder %s36_s9, 0  ;;  %s163_s10 = sand.u32 1, %s768_s14  }
  0x1a   : > { %s484_s11 = sshll.u32 %s163_s10, 4  ;;  %s536_s19 = sshll.u32 %s776_s16, 4 }
  0x1b   : > { %s898_s18 = scalar_select %p39_p9, %s768_s14, %s41_s6  }
  0x1c   : > { %s173_s26 = scalar_lea.hbm %s966_s0, %s536_s19  ;;  %s167_s28 = scalar_lea.vmem [#allocation3], %s484_s11 }
  0x1d   : > { %s176_s29 = sshll.u32 %s167_s28, 4  ;;  %s174_s21 = sshll.u32 %s173_s26, 4  ;;  %s177_s29 = int_to_ptr.vmem [resolvable:$true] %s176_s29  ;;  %s175_s21 = int_to_ptr.hbm [resolvable:$true] %s174_s21 }
  0x1e   : > { %p569_p2 = pnand %p577_p7, %p883_p3  ;;  %s164_s30 = scalar_lea.sflag [#allocation4], %s163_s10 }
  0x1f   : > { %s980_s1 = smov 64   ;;  %188 = sbr.rel (%p864_p8) target bundleno = 212 (0xd4), region = 32 }
  0x20   : > { %571 = dma.hbm_to_vmem [thread:$0]  (!%p569_p2), %s175_s21, 256, %s177_s29, %s164_s30, %s980_s1, %s980_s1, %s784_s4  }
  0x21   : > { %s912_s6 = sand.u32 (!%p864_p8), 1, %s764_s13  }
  0x22   : > { %s488_s9 = sshll.u32 (!%p864_p8), %s912_s6, 4  ;;  %s191_s11 = scalar_lea.sflag (!%p864_p8), [#allocation4], %s912_s6 }
  0x23   : > { %s194_s19 = scalar_lea.vmem (!%p864_p8), [#allocation3], %s488_s9 }
  0x24   : > { %747 = dma.done.wait (%p851_p4), %s191_s11, 256  }
  0x25   : > { %749 = vsyncadd (%p851_p4), %s191_s11, 4294967040 }
  0x26   : > { %751 = dma.done.wait (%p841_p1), [#allocation7], 1024  }
  0x27   : > { %753 = vsyncadd (%p841_p1), [#allocation7], 4294966272  ;;  %v544_v0 = vld [vmem:[#allocation6 + $0x38] sm:$0xff]  ;;  %v543_v1 = vld [vmem:[#allocation6 + $0x30] sm:$0xff]  ;;  %s490_s1 = sshll.u32 %s912_s6, 5  ;;  %s547_s27 = sshll.u32 %s772_s15, 5 }
  0x28   : > { %322 = vmatpush.bf16.msra.mxu0 %v544_v0  ;;  %548 = vmatpush.bf16.msra.mxu1 %v544_v0  ;;  %v542_v2 = vld [vmem:[#allocation6 + $0x28] sm:$0xff]  ;;  %v541_v3 = vld [vmem:[#allocation6 + $0x20] sm:$0xff]  ;;  %v540_v4 = vld [vmem:[#allocation6 + $0x18] sm:$0xff]  ;;  %s222_s30 = scalar_lea.vmem [#allocation8], %s490_s1  ;;  %s380_s10 = scalar_lea.hbm %s969_s3, %s547_s27 }
  0x29   : > { %v539_v5 = vld [vmem:[#allocation6 + $0x10] sm:$0xff]  ;;  %v538_v6 = vld [vmem:[#allocation6 + $0x8] sm:$0xff]  ;;  %v537_v7 = vld [vmem:[#allocation6] sm:$0xff]  ;;  %s381_s24 = sshll.u32 %s222_s30, 4  ;;  %s383_s25 = sshll.u32 %s380_s10, 4  ;;  %s382_s24 = int_to_ptr.vmem [resolvable:$true] %s381_s24  ;;  %s384_s25 = int_to_ptr.hbm [resolvable:$true] %s383_s25 }
  0x2a   : > { %v545_v8 = vld [vmem:[%s194_s19] sm:$0xff]  ;;  %v546_v9 = vld [vmem:[%s194_s19 + $0x8] sm:$0xff]  ;;  %s369_s15 = scalar_lea.sflag [#allocation5], %s912_s6  ;;  %s708_s26 = sshra.s32 %s384_s25, 4  ;;  %s709_s26 = int_to_ptr.hbm [resolvable:$true] %s708_s26 }
  0x2b   : > { %v633_v10 = vld [vmem:[%s968_s2] ss:$0 sm:$0xff]  ;;  %s710_s28 = scalar_lea.hbm %s709_s26, 32  ;;  %s714_s9 = scalar_lea.hbm %s969_s3, 64 }
  0x2c   : > { %323 = vmatpush.bf16.msra.mxu0 %v543_v1  ;;  %549 = vmatpush.bf16.msra.mxu1 %v543_v1  ;;  %p711_p1 = scmp.ne.s32.totalorder %s709_s26, %s710_s28  ;;  %p715_p10 = scmp.lt.s32.totalorder %s709_s26, %s969_s3 }
  0x2d   : > { %p716_p12 = scmp.lt.s32.totalorder %s714_s9, %s710_s28 }
  0x2e   : > { %p712_p4 = pnand %p711_p1, %p889_p5 }
  0x2f   : > { %p717_p13 = por %p716_p12, %p715_p10 }
  0x30   : > { %324 = vmatpush.bf16.msra.mxu0 %v542_v2  ;;  %550 = vmatpush.bf16.msra.mxu1 %v542_v2  ;;  %p713_p8 = pneg %p712_p4 }
  0x32   : > { %p718_p0 = pnand %p717_p13, %p713_p8 }
  0x34   : > { %325 = vmatpush.bf16.msra.mxu0 %v541_v3  ;;  %551 = vmatpush.bf16.msra.mxu1 %v541_v3 }
  0x38   : > { %326 = vmatpush.bf16.msra.mxu0 %v540_v4  ;;  %552 = vmatpush.bf16.msra.mxu1 %v540_v4 }
  0x3c   : > { %327 = vmatpush.bf16.msra.mxu0 %v539_v5  ;;  %553 = vmatpush.bf16.msra.mxu1 %v539_v5 }
  0x40   : > { %328 = vmatpush.bf16.msra.mxu0 %v538_v6  ;;  %554 = vmatpush.bf16.msra.mxu1 %v538_v6 }
  0x44   : > { %329 = vmatpush.bf16.msra.mxu0 %v537_v7  ;;  %555 = vmatpush.bf16.msra.mxu1 %v537_v7 }
  0x47   : > { %330 = vmatmul.bf16.vlgmr.msra.gmra.mxu0 %v545_v8  ;;  %335 = vmatmul.bf16.vlgmr.msra.gmra.mxu1 %v546_v9 }
  0xc4   : > { %v331_v11 = vpop.f32.mrf.mxu0  ;;  %v336_v12 = vpop.f32.mrf.mxu1 }
  0xc5   : > { %v360_v13 = vadd.f32 %v633_v10, %v331_v11  ;;  %v362_v14 = vadd.f32 %v633_v10, %v336_v12 }
  0xc7   : > { %364 = vst [vmem:[%s222_s30] sm:$0xff] %v360_v13 }
  0xc8   : > { %366 = vst [vmem:[%s222_s30 + $0x10] sm:$0xff] %v362_v14 }
  0xcc   : > { %v333_v15 = vpop.f32.mrf.mxu0  ;;  %v338_v16 = vpop.f32.mrf.mxu1 }
  0xcd   : > { %v361_v17 = vadd.f32 %v633_v10, %v333_v15  ;;  %v363_v18 = vadd.f32 %v633_v10, %v338_v16 }
  0xcf   : > { %365 = vst [vmem:[%s222_s30 + $0x8] sm:$0xff] %v361_v17 }
  0xd0   : > { %367 = vst [vmem:[%s222_s30 + $0x18] sm:$0xff] %v363_v18 }
  0xd1   : > { %721 = shalt.err (!%p718_p0)
}
  0xd2   : > { %s785_s6 = smov 128   ;;  %s786_s1 = smov 8  }
  0xd3   : > { %562 = dma.vmem_to_hbm [thread:$0]  (%p889_p5), %s382_s24, 512, %s384_s25, %s369_s15, %s785_s6, %s785_s6, %s786_s1  }
  0xd4 PF: > { %s398_s20 = sand.u32 1, %s760_s12   ;;  %p573_p3 = pnand %p483_p11, %p856_p6 }
  0xd5   : > { %s399_s22 = scalar_lea.sflag [#allocation5], %s398_s20 }
  0xd6   : > { %p574_p7 = pneg %p573_p3 }
  0xd8   : > { %755 = dma.done.wait (%p574_p7), %s399_s22, 512  }
  0xd9   : > { %757 = vsyncadd (%p574_p7), %s399_s22, 4294966784  ;;  %s20_s17 = sadd.s32 1, %s780_s17   ;;  %s981_s12 = smov %s764_s13 }
  0xda   : > { %p17_p9 = scmp.ge.s32.totalorder %s20_s17, 4   ;;  %s982_s13 = smov %s768_s14 }
  0xdb   : > { %s983_s14 = smov %s898_s18  ;;  %s984_s15 = smov %s776_s16 }
  0xdc   : > { %s985_s16 = smov %s987_s5  ;;  %19 = sbr.rel (!%p17_p9) target bundleno = 9 (0x9), region = 90 }
  0xe1   :  { %405 = vsyncpa [#allocation4], 1 }
  0xe2   :  { %407 = vsyncpa [#allocation4 + $0x1], 1 }
  0xe3   :  { %408 = vsyncpa [#allocation7], 1 }
  0xe4   :  { %409 = vsyncpa [#allocation5], 1 }
  0xe5   :  { %411 = vsyncpa [#allocation5 + $0x1], 1 }

</bundles_post_ra>
